<compile_context>
chip_gen: v7x
topology: tpu7x:2x2x1
jax: 0.10.0
libtpu: 0.0.40
codegen_flags: <defaults>
</compile_context>

<pallas_src>
import functools

import jax
import jax.numpy as jnp
import numpy as np
from jax import lax
from jax.experimental import pallas as pl
from jax.experimental.pallas import tpu as pltpu


def _round_up(x, m):
    return ((x + m - 1) // m) * m


def sine_kernel(scal_ref, nrows_ref,
                i_ref, j_ref, k_ref,
                w11_ref, w12_ref, w2_ref,
                out_ref, *, tile_b):
    """One batch tile of the SiNE triplet hinge loss.

    scal_ref : SMEM (3,)  f32   [delta, bias1, bias2]
    nrows_ref: SMEM (1,)  i32   actual (unpadded) batch size
    i/j/k_ref: VMEM (tile_b, dim1)   gathered embeddings (compute dtype)
    w11_ref  : VMEM (dim1, dim2)     layer11 weight, transposed (compute dtype)
    w12_ref  : VMEM (dim1, dim2)     layer12 weight, transposed (compute dtype)
    w2_ref   : VMEM (dim2, 1)        layer2 weight, transposed (compute dtype)
    out_ref  : VMEM (1, 1, 1) f32    per-tile partial hinge sum
    """
    delta = scal_ref[0]
    b1 = scal_ref[1]
    b2 = scal_ref[2]
    n_valid = nrows_ref[0]

    i_emb = i_ref[...]
    j_emb = j_ref[...]
    k_emb = k_ref[...]
    cdt = i_emb.dtype

    # Shared i-term computed once; no concatenates, no duplicated MXU work.
    pre_i = jnp.dot(i_emb, w11_ref[...], preferred_element_type=jnp.float32)
    pre_j = jnp.dot(j_emb, w12_ref[...], preferred_element_type=jnp.float32)
    pre_k = jnp.dot(k_emb, w12_ref[...], preferred_element_type=jnp.float32)

    # TODO(synk): on v6e/v7x the tanh could run in bf16 (bf16 EUP) for ~2x
    # transcendental throughput; kept f32 here so the same kernel is v5e-safe.
    z_pos = jnp.tanh(pre_i + pre_j + b1)                  # (T, dim2) f32
    z_neg = jnp.tanh(pre_i + pre_k + b1)

    # Layer 2 on the MXU with compute-dtype operands, f32 accumulation.
    f_pos = jnp.tanh(jnp.dot(z_pos.astype(cdt), w2_ref[...],
                             preferred_element_type=jnp.float32) + b2)  # (T, 1)
    f_neg = jnp.tanh(jnp.dot(z_neg.astype(cdt), w2_ref[...],
                             preferred_element_type=jnp.float32) + b2)

    hinge = jnp.maximum(0.0, f_pos + delta - f_neg)       # (T, 1) f32

    # Zero out padded batch rows, then reduce to a single per-tile partial sum
    # (no lane-sparse per-row writeback).
    base = pl.program_id(0) * tile_b
    row_ids = base + lax.broadcasted_iota(jnp.int32, (tile_b, 1), 0)
    hinge = jnp.where(row_ids < n_valid, hinge, 0.0)

    out_ref[...] = jnp.sum(hinge).reshape(1, 1, 1)


def sine_forward(embeddings, w11, w12, w2, bias1, bias2, xi, xj, xk, delta,
                 *, tile_b=2048, compute_dtype=jnp.bfloat16):
    """JAX wrapper reproducing SiNE.forward.

    embeddings: (num_nodes+1, dim1) f32
    w11, w12:   (dim2, dim1) f32  (PyTorch nn.Linear weight layout)
    w2:         (1, dim2)    f32
    bias1/2:    (1,)         f32
    xi/xj/xk:   (B,)         int32 node indices
    delta:      python float / 0-d
    Returns scalar f32 loss.
    """
    dim1 = embeddings.shape[1]
    dim2 = w11.shape[0]
    B = xi.shape[0]

    # Batch tile: large enough to amortize per-grid-step overhead, rounded to
    # 16 rows for bf16 sublane packing.
    tile_b = max(16, _round_up(min(tile_b, B), 16))
    # v7x has 2 TensorCores: keep >= 2 grid steps on the "parallel" axis
    # whenever the batch allows it.
    if pl.cdiv(B, tile_b) < 2 and B > 16:
        tile_b = max(16, _round_up(pl.cdiv(B, 2), 16))
    num_tiles = pl.cdiv(B, tile_b)
    padded_b = num_tiles * tile_b
    pad = padded_b - B

    # Glue: embedding gather (dense, batch-major).
    # TODO(synk): for very large B, move this gather in-kernel (scalar-prefetch
    # xi/xj/xk and gather from a VMEM-resident embedding table, or manual
    # per-row DMA from a pl.ANY HBM table) to avoid materializing three dense
    # (B, dim1) copies in HBM (~2x the minimal HBM traffic today).
    xi_p = jnp.pad(xi, (0, pad))
    xj_p = jnp.pad(xj, (0, pad))
    xk_p = jnp.pad(xk, (0, pad))
    i_emb = jnp.take(embeddings, xi_p, axis=0).astype(compute_dtype)
    j_emb = jnp.take(embeddings, xj_p, axis=0).astype(compute_dtype)
    k_emb = jnp.take(embeddings, xk_p, axis=0).astype(compute_dtype)

    w11_t = w11.T.astype(compute_dtype)          # (dim1, dim2)
    w12_t = w12.T.astype(compute_dtype)          # (dim1, dim2)
    w2_t = w2.T.astype(compute_dtype)            # (dim2, 1)

    scal = jnp.concatenate([
        jnp.asarray([delta], dtype=jnp.float32),
        jnp.asarray(bias1, dtype=jnp.float32).reshape(1),
        jnp.asarray(bias2, dtype=jnp.float32).reshape(1),
    ])
    nrows = jnp.asarray([B], dtype=jnp.int32)

    smem = pl.BlockSpec(memory_space=pltpu.MemorySpace.SMEM)
    emb_spec = pl.BlockSpec((tile_b, dim1), lambda b: (b, 0))
    w1_spec = pl.BlockSpec((dim1, dim2), lambda b: (0, 0))   # VMEM-resident
    w2_spec = pl.BlockSpec((dim2, 1), lambda b: (0, 0))      # VMEM-resident
    out_spec = pl.BlockSpec((1, 1, 1), lambda b: (b, 0, 0))  # per-tile partial sum

    partials = pl.pallas_call(
        functools.partial(sine_kernel, tile_b=tile_b),
        out_shape=jax.ShapeDtypeStruct((num_tiles, 1, 1), jnp.float32),
        grid_spec=pltpu.PrefetchScalarGridSpec(
            num_scalar_prefetch=0,
            grid=(num_tiles,),
            in_specs=[smem, smem,                 # scalars, nrows
                      emb_spec, emb_spec, emb_spec,
                      w1_spec, w1_spec, w2_spec],
            out_specs=out_spec),
        compiler_params=pltpu.CompilerParams(
            dimension_semantics=("parallel",),        # v7x: shard tiles across TCs
            vmem_limit_bytes=32 * 1024 * 1024),       # portable v5e/v6e/v7x budget
    )(scal, nrows, i_emb, j_emb, k_emb, w11_t, w12_t, w2_t)

    return jnp.sum(partials)                          # num_tiles scalars only


def sine_forward_ref(embeddings, w11, w12, w2, bias1, bias2, xi, xj, xk, delta):
    """Pure-JAX f32 reference mirroring the PyTorch forward."""
    i_emb = embeddings[xi]
    j_emb = embeddings[xj]
    k_emb = embeddings[xk]
    z11 = jnp.tanh(i_emb @ w11.T + j_emb @ w12.T + bias1)
    z12 = jnp.tanh(i_emb @ w11.T + k_emb @ w12.T + bias1)
    f_pos = jnp.tanh(z11 @ w2.T + bias2)
    f_neg = jnp.tanh(z12 @ w2.T + bias2)
    return jnp.sum(jnp.maximum(0.0, f_pos + delta - f_neg))


if __name__ == "__main__":
    # Small, deterministic setup consistent with SiNE(num_nodes, dim1, dim2).
    num_nodes, dim1, dim2 = 20, 32, 32
    batch = 8
    delta = 1.0

    key = jax.random.PRNGKey(0)
    k_emb, k_w11, k_w12, k_w2, k_i, k_j, k_k = jax.random.split(key, 7)

    # nn.Embedding default init: N(0, 1)
    embeddings = jax.random.normal(k_emb, (num_nodes + 1, dim1), dtype=jnp.float32)
    # nn.Linear default init: U(-1/sqrt(fan_in), 1/sqrt(fan_in)), no bias
    lim1 = 1.0 / np.sqrt(dim1)
    lim2 = 1.0 / np.sqrt(dim2)
    w11 = jax.random.uniform(k_w11, (dim2, dim1), jnp.float32, -lim1, lim1)
    w12 = jax.random.uniform(k_w12, (dim2, dim1), jnp.float32, -lim1, lim1)
    w2 = jax.random.uniform(k_w2, (1, dim2), jnp.float32, -lim2, lim2)
    bias1 = jnp.zeros((1,), dtype=jnp.float32)
    bias2 = jnp.zeros((1,), dtype=jnp.float32)

    # Triplet node indices (xi, xj, xk)
    xi = jax.random.randint(k_i, (batch,), 0, num_nodes + 1, dtype=jnp.int32)
    xj = jax.random.randint(k_j, (batch,), 0, num_nodes + 1, dtype=jnp.int32)
    xk = jax.random.randint(k_k, (batch,), 0, num_nodes + 1, dtype=jnp.int32)

    ref = sine_forward_ref(embeddings, w11, w12, w2, bias1, bias2, xi, xj, xk, delta)
    ref = np.asarray(jax.block_until_ready(ref))

    # f32 path: tight agreement with the reference.
    loss_f32 = sine_forward(embeddings, w11, w12, w2, bias1, bias2,
                            xi, xj, xk, delta, compute_dtype=jnp.float32)
    loss_f32 = np.asarray(jax.block_until_ready(loss_f32))
    assert np.allclose(loss_f32, ref, rtol=1e-4, atol=1e-5), (
        f"pallas(f32)={loss_f32} ref={ref}")

    # bf16 MXU path (production default): looser tolerance.
    loss_bf16 = sine_forward(embeddings, w11, w12, w2, bias1, bias2,
                             xi, xj, xk, delta, compute_dtype=jnp.bfloat16)
    loss_bf16 = np.asarray(jax.block_until_ready(loss_bf16))
    assert np.allclose(loss_bf16, ref, rtol=2e-2, atol=2e-2), (
        f"pallas(bf16)={loss_bf16} ref={ref}")

    print("KERNEL_OK")
</pallas_src>

<mosaic_0001>
module attributes {stable_mosaic.version = 11 : i64} {
  func.func @sine_kernel(%arg0: i32, %arg1: memref<3xf32, #tpu.memory_space<smem>>, %arg2: memref<1xi32, #tpu.memory_space<smem>>, %arg3: memref<16x32xf32, #tpu.memory_space<vmem>>, %arg4: memref<16x32xf32, #tpu.memory_space<vmem>>, %arg5: memref<16x32xf32, #tpu.memory_space<vmem>>, %arg6: memref<32x32xf32, #tpu.memory_space<vmem>>, %arg7: memref<32x32xf32, #tpu.memory_space<vmem>>, %arg8: memref<32x1xf32, #tpu.memory_space<vmem>>, %arg9: memref<1x1x1xf32, #tpu.memory_space<vmem>>) attributes {dimension_semantics = [#tpu.dimension_semantics<parallel>], iteration_bounds = array<i64: 1>, scalar_prefetch = 0 : i64, scratch_operands = 0 : i64, tpu.core_type = #tpu.core_type<tc>, window_params = [{transform_indices = @transform_0, window_bounds = array<i64: 3>}, {transform_indices = @transform_1, window_bounds = array<i64: 1>}, {transform_indices = @transform_2, window_bounds = array<i64: 16, 32>}, {transform_indices = @transform_3, window_bounds = array<i64: 16, 32>}, {transform_indices = @transform_4, window_bounds = array<i64: 16, 32>}, {pipeline_mode = #tpu.pipeline_mode<synchronous>, transform_indices = @transform_5, window_bounds = array<i64: 32, 32>}, {pipeline_mode = #tpu.pipeline_mode<synchronous>, transform_indices = @transform_6, window_bounds = array<i64: 32, 32>}, {pipeline_mode = #tpu.pipeline_mode<synchronous>, transform_indices = @transform_7, window_bounds = array<i64: 32, 1>}, {transform_indices = @transform_8, window_bounds = array<i64: 1, 1, 1>}]} {
    %c0 = arith.constant 0 : index
    %0 = memref.load %arg1[%c0] : memref<3xf32, #tpu.memory_space<smem>>
    %c1 = arith.constant 1 : index
    %1 = memref.load %arg1[%c1] : memref<3xf32, #tpu.memory_space<smem>>
    %c2 = arith.constant 2 : index
    %2 = memref.load %arg1[%c2] : memref<3xf32, #tpu.memory_space<smem>>
    %c0_0 = arith.constant 0 : index
    %3 = memref.load %arg2[%c0_0] : memref<1xi32, #tpu.memory_space<smem>>
    %c0_1 = arith.constant 0 : index
    %c0_2 = arith.constant 0 : index
    %4 = vector.load %arg3[%c0_1, %c0_2] : memref<16x32xf32, #tpu.memory_space<vmem>>, vector<16x32xf32>
    %c0_3 = arith.constant 0 : index
    %c0_4 = arith.constant 0 : index
    %5 = vector.load %arg4[%c0_3, %c0_4] : memref<16x32xf32, #tpu.memory_space<vmem>>, vector<16x32xf32>
    %c0_5 = arith.constant 0 : index
    %c0_6 = arith.constant 0 : index
    %6 = vector.load %arg5[%c0_5, %c0_6] : memref<16x32xf32, #tpu.memory_space<vmem>>, vector<16x32xf32>
    %c0_7 = arith.constant 0 : index
    %c0_8 = arith.constant 0 : index
    %7 = vector.load %arg6[%c0_7, %c0_8] : memref<32x32xf32, #tpu.memory_space<vmem>>, vector<32x32xf32>
    %cst = arith.constant dense<0.000000e+00> : vector<16x32xf32>
    %8 = tpu.matmul %4, %7, %cst {dimension_numbers = #tpu.dot_dimension_numbers<[1], [0], [0], [1], [0, 0, 1, 1], [], []>} : vector<16x32xf32>, vector<32x32xf32>, vector<16x32xf32> -> vector<16x32xf32>
    %c0_9 = arith.constant 0 : index
    %c0_10 = arith.constant 0 : index
    %9 = vector.load %arg7[%c0_9, %c0_10] : memref<32x32xf32, #tpu.memory_space<vmem>>, vector<32x32xf32>
    %cst_11 = arith.constant dense<0.000000e+00> : vector<16x32xf32>
    %10 = tpu.matmul %5, %9, %cst_11 {dimension_numbers = #tpu.dot_dimension_numbers<[1], [0], [0], [1], [0, 0, 1, 1], [], []>} : vector<16x32xf32>, vector<32x32xf32>, vector<16x32xf32> -> vector<16x32xf32>
    %c0_12 = arith.constant 0 : index
    %c0_13 = arith.constant 0 : index
    %11 = vector.load %arg7[%c0_12, %c0_13] : memref<32x32xf32, #tpu.memory_space<vmem>>, vector<32x32xf32>
    %cst_14 = arith.constant dense<0.000000e+00> : vector<16x32xf32>
    %12 = tpu.matmul %6, %11, %cst_14 {dimension_numbers = #tpu.dot_dimension_numbers<[1], [0], [0], [1], [0, 0, 1, 1], [], []>} : vector<16x32xf32>, vector<32x32xf32>, vector<16x32xf32> -> vector<16x32xf32>
    %13 = arith.addf %8, %10 : vector<16x32xf32>
    %14 = vector.broadcast %1 : f32 to vector<16x32xf32>
    %15 = arith.addf %13, %14 : vector<16x32xf32>
    %16 = math.tanh %15 : vector<16x32xf32>
    %17 = arith.addf %8, %12 : vector<16x32xf32>
    %18 = vector.broadcast %1 : f32 to vector<16x32xf32>
    %19 = arith.addf %17, %18 : vector<16x32xf32>
    %20 = math.tanh %19 : vector<16x32xf32>
    %c0_15 = arith.constant 0 : index
    %c0_16 = arith.constant 0 : index
    %21 = vector.load %arg8[%c0_15, %c0_16] : memref<32x1xf32, #tpu.memory_space<vmem>>, vector<32x1xf32>
    %cst_17 = arith.constant dense<0.000000e+00> : vector<16x1xf32>
    %22 = tpu.matmul %16, %21, %cst_17 {dimension_numbers = #tpu.dot_dimension_numbers<[1], [0], [0], [1], [0, 0, 1, 1], [], []>} : vector<16x32xf32>, vector<32x1xf32>, vector<16x1xf32> -> vector<16x1xf32>
    %23 = vector.broadcast %2 : f32 to vector<16x1xf32>
    %24 = arith.addf %22, %23 : vector<16x1xf32>
    %25 = math.tanh %24 : vector<16x1xf32>
    %c0_18 = arith.constant 0 : index
    %c0_19 = arith.constant 0 : index
    %26 = vector.load %arg8[%c0_18, %c0_19] : memref<32x1xf32, #tpu.memory_space<vmem>>, vector<32x1xf32>
    %cst_20 = arith.constant dense<0.000000e+00> : vector<16x1xf32>
    %27 = tpu.matmul %20, %26, %cst_20 {dimension_numbers = #tpu.dot_dimension_numbers<[1], [0], [0], [1], [0, 0, 1, 1], [], []>} : vector<16x32xf32>, vector<32x1xf32>, vector<16x1xf32> -> vector<16x1xf32>
    %28 = vector.broadcast %2 : f32 to vector<16x1xf32>
    %29 = arith.addf %27, %28 : vector<16x1xf32>
    %30 = math.tanh %29 : vector<16x1xf32>
    %31 = vector.broadcast %0 : f32 to vector<16x1xf32>
    %32 = arith.addf %25, %31 : vector<16x1xf32>
    %33 = arith.subf %32, %30 : vector<16x1xf32>
    %cst_21 = arith.constant 0.000000e+00 : f32
    %34 = vector.broadcast %cst_21 : f32 to vector<16x1xf32>
    %35 = arith.maximumf %34, %33 : vector<16x1xf32>
    %c16_i32 = arith.constant 16 : i32
    %36 = arith.muli %arg0, %c16_i32 : i32
    %37 = tpu.iota {dimensions = array<i32: 0>} : vector<16x1xi32>
    %38 = vector.broadcast %36 : i32 to vector<16x1xi32>
    %39 = arith.addi %38, %37 : vector<16x1xi32>
    %40 = vector.broadcast %3 : i32 to vector<16x1xi32>
    %41 = arith.cmpi slt, %39, %40 : vector<16x1xi32>
    %cst_22 = arith.constant 0.000000e+00 : f32
    %42 = vector.broadcast %cst_22 : f32 to vector<16x1xf32>
    %43 = arith.select %41, %35, %42 : vector<16x1xi1>, vector<16x1xf32>
    %44 = vector.shape_cast %43 : vector<16x1xf32> to vector<1x16x1xf32>
    %cst_23 = arith.constant dense<0.000000e+00> : vector<1xf32>
    %45 = vector.multi_reduction <add>, %44, %cst_23 [1, 2] : vector<1x16x1xf32> to vector<1xf32>
    %46 = vector.shape_cast %45 : vector<1xf32> to vector<1x1x1xf32>
    %47 = vector.extract %46[0, 0, 0] : f32 from vector<1x1x1xf32>
    %48 = vector.broadcast %47 : f32 to vector<1x1x1xf32>
    %c0_24 = arith.constant 0 : index
    %c0_25 = arith.constant 0 : index
    %c0_26 = arith.constant 0 : index
    %49 = vector.load %arg9[%c0_24, %c0_25, %c0_26] : memref<1x1x1xf32, #tpu.memory_space<vmem>>, vector<1x1x1xf32>
    tpu.vector_store %arg9[%c0_24, %c0_25, %c0_26], %48 {strides = array<i32>} : memref<1x1x1xf32, #tpu.memory_space<vmem>>, vector<1x1x1xf32>,
    return
  }
  func.func @transform_0(%arg0: i32) -> i32 {
    %c0_i32 = arith.constant 0 : i32
    %c0_i32_0 = arith.constant 0 : i32
    return %c0_i32 : i32
  }
  func.func @transform_1(%arg0: i32) -> i32 {
    %c0_i32 = arith.constant 0 : i32
    %c0_i32_0 = arith.constant 0 : i32
    return %c0_i32 : i32
  }
  func.func @transform_2(%arg0: i32) -> (i32, i32) {
    %c0_i32 = arith.constant 0 : i32
    %c0_i32_0 = arith.constant 0 : i32
    return %arg0, %c0_i32 : i32, i32
  }
  func.func @transform_3(%arg0: i32) -> (i32, i32) {
    %c0_i32 = arith.constant 0 : i32
    %c0_i32_0 = arith.constant 0 : i32
    return %arg0, %c0_i32 : i32, i32
  }
  func.func @transform_4(%arg0: i32) -> (i32, i32) {
    %c0_i32 = arith.constant 0 : i32
    %c0_i32_0 = arith.constant 0 : i32
    return %arg0, %c0_i32 : i32, i32
  }
  func.func @transform_5(%arg0: i32) -> (i32, i32) {
    %c0_i32 = arith.constant 0 : i32
    %c0_i32_0 = arith.constant 0 : i32
    %c0_i32_1 = arith.constant 0 : i32
    return %c0_i32, %c0_i32_0 : i32, i32
  }
  func.func @transform_6(%arg0: i32) -> (i32, i32) {
    %c0_i32 = arith.constant 0 : i32
    %c0_i32_0 = arith.constant 0 : i32
    %c0_i32_1 = arith.constant 0 : i32
    return %c0_i32, %c0_i32_0 : i32, i32
  }
  func.func @transform_7(%arg0: i32) -> (i32, i32) {
    %c0_i32 = arith.constant 0 : i32
    %c0_i32_0 = arith.constant 0 : i32
    %c0_i32_1 = arith.constant 0 : i32
    return %c0_i32, %c0_i32_0 : i32, i32
  }
  func.func @transform_8(%arg0: i32) -> (i32, i32, i32) {
    %c0_i32 = arith.constant 0 : i32
    %c0_i32_0 = arith.constant 0 : i32
    %c0_i32_1 = arith.constant 0 : i32
    return %arg0, %c0_i32, %c0_i32_0 : i32, i32, i32
  }
}

</mosaic_0001>

<bundles_post_ra>
// kernel: tpu_custom_call.1
= control target key start
LH: loop header
LB: loop body
LE: loop exit
PB: predicated region body
PF: predicated region fallthrough
CT: control target
= control target key end

     0   :  { %14 = vsyncpa [#allocation6], 0  ;;  %s1015_s0 = inlined_call_operand.vmem [shape: f32[3], index: 0, kind: input, shape index: {}]   ;;  %s1016_s1 = inlined_call_operand.<no memory space> [shape: s32[1], index: 1, kind: input, shape index: {}]   ;;  %s1017_s2 = inlined_call_operand.vmem [shape: f32[16,32], index: 2, kind: input, shape index: {}]   ;;  %s1018_s3 = inlined_call_operand.hbm [shape: f32[16,32], index: 3, kind: input, shape index: {}]   ;;  %s1019_s4 = inlined_call_operand.hbm [shape: f32[16,32], index: 4, kind: input, shape index: {}]   ;;  %s1020_s5 = inlined_call_operand.vmem [shape: f32[32,32], index: 5, kind: input, shape index: {}]   ;;  %s1021_s6 = inlined_call_operand.hbm [shape: f32[32,32], index: 6, kind: input, shape index: {}]   ;;  %s1022_s7 = inlined_call_operand.vmem [shape: f32[32,1], index: 7, kind: input, shape index: {}]   ;;  %s1023_s8 = inlined_call_operand.hbm [shape: f32[1,1,1], index: 8, kind: output, shape index: {}]  }
   0x1   :  { %15 = vsyncpa [#allocation4], 0 }
   0x2   :  { %16 = vsyncpa [#allocation9], 0 }
   0x3   :  { %17 = vsyncpa [#allocation5], 0  ;;  %s24_s29 = sshll.u32 %s1015_s0, 4  ;;  %s853_s30 = smov [#allocation8]   ;;  %s25_s29 = int_to_ptr.vmem [resolvable:$true] %s24_s29 }
   0x4   :  { %s49_s9 = sshll.u32 %s853_s30, 4  ;;  %s745_s12 = scalar_lea.hbm %s1019_s4, 256  ;;  %s50_s9 = int_to_ptr.vmem [resolvable:$true] %s49_s9 }
   0x5   :  { %p746_p0 = scmp.ne.s32.totalorder %s1019_s4, %s745_s12  ;;  %p749_p1 = scmp.lt.u32.totalorder %s745_s12, %s1019_s4 }
   0x7   :  { %p751_p2 = pnand %p749_p1, %p746_p0 }
   0x9   :  { %754 = shalt.err (!%p751_p2)
}
   0xa   :  { %s755_s17 = scalar_lea.vmem %s50_s9, 256  ;;  %p760_p4 = scmp.lt.s32.totalorder %s50_s9, %s50_s9 }
   0xb   :  { %p756_p3 = scmp.ne.s32.totalorder %s50_s9, %s755_s17  ;;  %p761_p5 = scmp.lt.s32.totalorder %s755_s17, %s755_s17 }
   0xd   :  { %p762_p6 = por %p761_p5, %p760_p4 }
   0xf   :  { %p763_p7 = pnand %p762_p6, %p756_p3 }
  0x11   :  { %766 = shalt.err (!%p763_p7)
}
  0x12   :  { %s854_s0 = smov 128   ;;  %s855_s18 = smov 8  }
  0x13   :  { %55 = dma.hbm_to_vmem [thread:$0]  %s1019_s4, 256, %s50_s9, [#allocation9], %s854_s0, %s854_s0, %s855_s18  }
  0x14   :  { %s767_s21 = scalar_lea.vmem %s25_s29, 16  ;;  %p772_p9 = scmp.lt.s32.totalorder %s25_s29, %s25_s29 }
  0x15   :  { %p768_p8 = scmp.ne.s32.totalorder %s25_s29, %s767_s21  ;;  %p773_p10 = scmp.lt.s32.totalorder %s767_s21, %s767_s21 }
  0x17   :  { %p774_p11 = por %p773_p10, %p772_p9 }
  0x19   :  { %p775_p12 = pnand %p774_p11, %p768_p8 }
  0x1b   :  { %778 = shalt.err (!%p775_p12)
}
  0x1c   :  { %s856_s22 = smov [#allocation3]   ;;  %s857_s23 = smov [#allocation7]  }
  0x1d   :  { %27 = dma.vmem_to_smem %s25_s29, 16, %s856_s22, [#allocation6]  }
  0x1e   :  { %s37_s24 = sshll.u32 %s857_s23, 4  ;;  %s858_s25 = smov [#allocation10]   ;;  %s38_s24 = int_to_ptr.vmem [resolvable:$true] %s37_s24 }
  0x1f   :  { %s63_s26 = sshll.u32 %s858_s25, 4  ;;  %s779_s4 = scalar_lea.hbm %s1018_s3, 256  ;;  %s923_s26 = int_to_ptr.vmem [resolvable:$true] %s63_s26 }
  0x20   :  { %p780_p13 = scmp.ne.s32.totalorder %s1018_s3, %s779_s4  ;;  %p783_p0 = scmp.lt.u32.totalorder %s779_s4, %s1018_s3 }
  0x22   :  { %p785_p1 = pnand %p783_p0, %p780_p13 }
  0x24   :  { %788 = shalt.err (!%p785_p1)
}
  0x25   :  { %s789_s29 = scalar_lea.vmem %s38_s24, 256  ;;  %p794_p3 = scmp.lt.s32.totalorder %s38_s24, %s38_s24 }
  0x26   :  { %p790_p2 = scmp.ne.s32.totalorder %s38_s24, %s789_s29  ;;  %p795_p4 = scmp.lt.s32.totalorder %s789_s29, %s789_s29 }
  0x28   :  { %p796_p5 = por %p795_p4, %p794_p3 }
  0x2a   :  { %p797_p6 = pnand %p796_p5, %p790_p2 }
  0x2c   :  { %800 = shalt.err (!%p797_p6)
}
  0x2d   :  { %43 = dma.hbm_to_vmem [thread:$0]  %s1018_s3, 256, %s38_s24, [#allocation4], %s854_s0, %s854_s0, %s855_s18  }
  0x2e   :  { %s801_s16 = scalar_lea.hbm %s1021_s6, 512 }
  0x2f   :  { %p802_p7 = scmp.ne.s32.totalorder %s1021_s6, %s801_s16  ;;  %p805_p8 = scmp.lt.u32.totalorder %s801_s16, %s1021_s6 }
  0x31   :  { %p807_p9 = pnand %p805_p8, %p802_p7 }
  0x33   :  { %810 = shalt.err (!%p807_p9)
}
  0x34   :  { %s811_s22 = scalar_lea.vmem %s923_s26, 512  ;;  %p816_p11 = scmp.lt.s32.totalorder %s923_s26, %s923_s26 }
  0x35   :  { %p812_p10 = scmp.ne.s32.totalorder %s923_s26, %s811_s22  ;;  %p817_p12 = scmp.lt.s32.totalorder %s811_s22, %s811_s22 }
  0x37   :  { %p818_p13 = por %p817_p12, %p816_p11 }
  0x39   :  { %p819_p0 = pnand %p818_p13, %p812_p10 }
  0x3b   :  { %822 = shalt.err (!%p819_p0)
}
  0x3c   :  { %69 = dma.hbm_to_vmem [thread:$0]  %s1021_s6, 512, %s923_s26, [#allocation9], %s854_s0, %s854_s0, %s855_s18  }
  0x3d   :  { %845 = dma.done.wait [#allocation6], 16  }
  0x3e   :  { %846 = vsyncadd [#allocation6], 4294967280 }
  0x3f   :  { %847 = dma.done.wait [#allocation4], 256  }
  0x40   :  { %848 = vsyncadd [#allocation4], 4294967040 }
  0x41   :  { %849 = dma.done.wait [#allocation9], 768  }
  0x42   :  { %850 = vsyncadd [#allocation9], 4294966528 }
  0x43   :  { %84 = sfence }
  0x44   :  { %v95_v0 = vld [vmem:[%s1020_s5] sm:$0xff]  ;;  %v96_v1 = vld [vmem:[%s1020_s5 + $0x8] sm:$0xff]  ;;  %vm99_vm0 = vcmask 261120   ;;  %v97_v5 = vld [vmem:[%s1020_s5 + $0x10] sm:$0xff]  ;;  %s583_s16 = sld [smem:[#allocation3 + $0x1]]  ;;  %s85_s17 = sld [smem:[#allocation3]]  ;;  %v539_v52 = vlaneseq  ;;  %v545_v59 = vstv %s1016_s1 }
  0x45   :  { %v181_v2 = vld [vmem:[#allocation10] sm:$0xff]  ;;  %v680_v3 = vpack.c.bf16 %v96_v1, %v95_v0  ;;  %v182_v4 = vld [vmem:[#allocation10 + $0x8] sm:$0xff]  ;;  %v98_v6 = vld [vmem:[%s1020_s5 + $0x18] sm:$0xff]  ;;  %vm550_vm3 = vcmask 7168   ;;  %s859_s1 = smov [#allocation11]   ;;  %vm564_vm4 = vcmask 0  }
  0x46   :  { %v688_v7 = vpack.c.bf16 %v182_v4, %v181_v2  ;;  %v684_v8 = vpack.c.bf16 %v98_v6, %v97_v5  ;;  %v183_v9 = vld [vmem:[#allocation10 + $0x10] sm:$0xff]  ;;  %v184_v10 = vld [vmem:[#allocation10 + $0x18] sm:$0xff]  ;;  %v89_v11 = vld [vmem:[%s1017_s2] sm:$0xff]  ;;  %v540_v53 = vshrl.u32 %v539_v52, 7  ;;  %s572_s21 = sshll.u32 %s859_s1, 4  ;;  %s573_s21 = int_to_ptr.vmem [resolvable:$true] %s572_s21 }
  0x47   :  { %681 = vmatprep.subr.bf16.mxu0 %v680_v3  ;;  %v692_v12 = vpack.c.bf16 %v184_v10, %v183_v9  ;;  %633 = vmatprep.mubr.msk.f32.mxu0 %vm99_vm0, %v89_v11  ;;  %v91_v13 = vld [vmem:[#allocation7] sm:$0xff]  ;;  %v90_v14 = vld [vmem:[%s1017_s2 + $0x8] sm:$0xff]  ;;  %v93_v16 = vld [vmem:[#allocation8] sm:$0xff]  ;;  %s823_s3 = scalar_lea.vmem %s573_s21, 16  ;;  %s827_s23 = scalar_lea.vmem %s573_s21, 32 }
  0x48   :  { %689 = vmatprep.subr.bf16.mxu1 %v688_v7  ;;  %683 = vmatpush3.bf16.msra.mxu0 %v680_v3  ;;  %v92_v15 = vld [vmem:[#allocation7 + $0x8] sm:$0xff]  ;;  %v94_v17 = vld [vmem:[#allocation8 + $0x8] sm:$0xff]  ;;  %v360_v18 = vld [vmem:[%s1022_s7] sm:$0xff]  ;;  %v541_v57 = vadd.s32 8, %v540_v53  ;;  %vm546_vm2 = vcmp.lt.s32.totalorder %v540_v53, %v545_v59  ;;  %p824_p1 = scmp.ne.s32.totalorder %s573_s21, %s823_s3  ;;  %p828_p2 = scmp.lt.s32.totalorder %s573_s21, %s573_s21 }
  0x49   :  { %691 = vmatpush3.bf16.msra.mxu1 %v688_v7  ;;  %685 = vmatprep.subr.bf16.mxu0 %v684_v8  ;;  %v361_v19 = vld [vmem:[%s1022_s7 + $0x8] sm:$0xff]  ;;  %v362_v21 = vld [vmem:[%s1022_s7 + $0x10] sm:$0xff]  ;;  %v363_v22 = vld [vmem:[%s1022_s7 + $0x18] sm:$0xff]  ;;  %s584_s7 = sld [smem:[#allocation3 + $0x2]]  ;;  %p829_p3 = scmp.lt.s32.totalorder %s827_s23, %s823_s3 }
  0x4a   :  { %693 = vmatprep.subr.bf16.mxu1 %v692_v12  ;;  %644 = vmatprep.mubr.msk.f32.mxu1 %vm99_vm0, %v91_v13  ;;  %v704_v20 = vpack.c.bf16 %v361_v19, %v360_v18  ;;  %v708_v23 = vpack.c.bf16 %v363_v22, %v362_v21  ;;  %v349_v26 = vstv %s583_s16  ;;  %v531_v55 = vstv %s85_s17 }
  0x4b   :  { %vm547_vm1 = vcmp.lt.s32.totalorder %v541_v57, %v545_v59  ;;  %p830_p4 = por %p829_p3, %p828_p2 }
  0x4c   :  { %687 = vmatpush3.bf16.msra.mxu0 %v684_v8 }
  0x4d   :  { %695 = vmatpush3.bf16.msra.mxu1 %v692_v12  ;;  %697 = vmatprep.subr.bf16.mxu0 %v688_v7  ;;  %p831_p5 = pnand %p830_p4, %p824_p1 }
  0x4e   :  { %705 = vmatprep.subr.bf16.mxu1 %v704_v20 }
  0x4f   :  { %634 = vmatmul.mubr.msk.f32.vlgmr.msra.gmra.mrb[0].mxu0 %vm99_vm0, %v90_v14  ;;  %v364_v43 = vstv %s584_s7 }
  0x50   :  { %645 = vmatmul.mubr.msk.f32.vlgmr.msra.gmra.mrb[0].mxu1 %vm99_vm0, %v92_v15  ;;  %699 = vmatpush3.bf16.msra.mxu0 %v688_v7 }
  0x51   :  { %701 = vmatprep.subr.bf16.mxu0 %v692_v12  ;;  %655 = vmatprep.mubr.msk.f32.mxu0 %vm99_vm0, %v93_v16 }
  0x52   :  { %707 = vmatpush3.bf16.msra.mxu1 %v704_v20 }
  0x53   :  { %709 = vmatprep.subr.bf16.mxu1 %v708_v23 }
  0x54   :  { %703 = vmatpush3.bf16.msra.mxu0 %v692_v12 }
  0x55   :  { %713 = vmatprep.subr.bf16.mxu0 %v704_v20 }
  0x56   :  { %711 = vmatpush3.bf16.msra.mxu1 %v708_v23 }
  0x57   :  { %656 = vmatmul.mubr.msk.f32.vlgmr.msra.gmra.mrb[2].mxu0 %vm99_vm0, %v94_v17 }
  0x58   :  { %715 = vmatpush3.bf16.msra.mxu0 %v704_v20 }
  0x59   :  { %717 = vmatprep.subr.bf16.mxu0 %v708_v23 }
  0x5c   :  { %719 = vmatpush3.bf16.msra.mxu0 %v708_v23 }
 0x122   :  { %v635_v24 = vpop.f32.mrb[0].mxu0 }
 0x123   :  { %v646_v25 = vpop.f32.mrb[0].mxu1  ;;  %v172_v27 = vpop.f32.mrb[1].mxu0 }
 0x124   :  { %v348_v28 = vadd.f32 %v646_v25, %v635_v24  ;;  %v257_v29 = vpop.f32.mrb[1].mxu1 }
 0x125   :  { %v347_v30 = vadd.f32 %v257_v29, %v172_v27 }
 0x126   :  { %v351_v31 = vadd.f32 %v349_v26, %v348_v28 }
 0x127   :  { %v350_v32 = vadd.f32 %v349_v26, %v347_v30 }
 0x128   :  { %729 = vtanh.f32 %v351_v31 }
 0x129   :  { %731 = vtanh.f32 %v350_v32 }
 0x12a   :  { %v657_v33 = vpop.f32.mrb[2].mxu0 }
 0x12b   :  { %v355_v34 = vadd.f32 %v657_v33, %v635_v24  ;;  %v338_v35 = vpop.f32.mrb[3].mxu0 }
 0x12c   :  { %v354_v36 = vadd.f32 %v338_v35, %v172_v27 }
 0x12d   :  { %v357_v37 = vadd.f32 %v355_v34, %v349_v26 }
 0x12e   :  { %v356_v38 = vadd.f32 %v354_v36, %v349_v26 }
 0x130   :  { %733 = vtanh.f32 %v356_v38 }
 0x131   :  { %735 = vtanh.f32 %v357_v37 }
 0x132   :  { %v730_v39 = vpop.eup %729 }
 0x133   :  { %v732_v40 = vpop.eup %731 }
 0x134   :  { %666 = vmatprep.mubr.msk.f32.mxu1 %vm99_vm0, %v732_v40 }
 0x135   :  { %667 = vmatmul.mubr.msk.f32.vlgmr.msra.gmra.mrb[2].mxu1 %vm99_vm0, %v730_v39 }
 0x13a   :  { %v734_v41 = vpop.eup %733 }
 0x13b   :  { %v736_v42 = vpop.eup %735  ;;  %677 = vmatprep.mubr.msk.f32.mxu0 %vm99_vm0, %v734_v41 }
 0x13c   :  { %678 = vmatmul.mubr.msk.f32.vlgmr.msra.gmra.mrb[4].mxu0 %vm99_vm0, %v736_v42 }
 0x208   :  { %v668_v44 = vpop.f32.mrb[2].mxu1 }
 0x209   :  { %v437_v45 = vpop.f32.mrb[3].mxu1  ;;  %v443_v46 = vadd.f32 %v668_v44, %v364_v43 }
 0x20a   :  { %v438_v47 = vadd.f32 %v437_v45, %v364_v43 }
 0x20b   :  { %737 = vtanh.f32 %v443_v46 }
 0x20c   :  { %739 = vtanh.f32 %v438_v47 }
 0x20f   :  { %v679_v48 = vpop.f32.mrb[4].mxu0 }
 0x210   :  { %v526_v49 = vadd.f32 %v679_v48, %v364_v43  ;;  %v520_v50 = vpop.f32.mrb[5].mxu0 }
 0x211   :  { %v521_v51 = vadd.f32 %v520_v50, %v364_v43 }
 0x212   :  { %741 = vtanh.f32 %v526_v49 }
 0x213   :  { %743 = vtanh.f32 %v521_v51 }
 0x215   :  { %v738_v54 = vpop.eup %737 }
 0x216   :  { %v740_v56 = vpop.eup %739  ;;  %v533_v58 = vadd.f32 %v738_v54, %v531_v55 }
 0x217   :  { %v532_v61 = vadd.f32 %v740_v56, %v531_v55 }
 0x21c   :  { %v742_v60 = vpop.eup %741 }
 0x21d   :  { %v744_v62 = vpop.eup %743  ;;  %v535_v63 = vsub.f32 %v533_v58, %v742_v60 }
 0x21e   :  { %v534_v0 = vsub.f32 %v532_v61, %v744_v62 }
 0x21f   :  { %v537_v1 = vmax.f32 %v535_v63, 0.0 }
 0x220   :  { %v536_v2 = vmax.f32 %v534_v0, 0.0 }
 0x221   :  { %v549_v3 = vsel %vm547_vm1, %v537_v1, 0.0 }
 0x222   :  { %v548_v4 = vsel %vm546_vm2, %v536_v2, 0.0  ;;  %v552_v5 = vsel %vm550_vm3, %v549_v3, 0.0 }
 0x223   :  { %v551_v6 = vsel %vm550_vm3, %v548_v4, 0.0 }
 0x224   :  { %v553_v7 = vadd.f32 %v552_v5, %v551_v6 }
 0x226   :  { %554 = vadd.xlane.f32.xlu0 %v553_v7 }
 0x2b3   :  { %v555_v8 = vpop.xlane.xlu0 %554 }
 0x2b4   :  { %v556_v9 = vrot.slane %v555_v8, 4 }
 0x2b6   :  { %v557_v10 = vadd.f32 %v556_v9, %v555_v8 }
 0x2b8   :  { %v558_v11 = vrot.slane %v557_v10, 2 }
 0x2ba   :  { %v559_v12 = vadd.f32 %v558_v11, %v557_v10 }
 0x2bc   :  { %v560_v13 = vrot.slane %v559_v12, 1 }
 0x2be   :  { %v561_v14 = vadd.f32 %v560_v13, %v559_v12 }
 0x2c0   :  { %720 = vpush %v561_v14 }
 0x2f1   :  { %s721_s22 = spop %720 }
 0x2f2   :  { %v563_v15 = vstv %s721_s22 }
 0x2f3   :  { %565 = vst.msk [vmem:[#allocation11] sm:$0x1] %vm564_vm4, %v563_v15 }
 0x2f4   :  { %834 = shalt.err (!%p831_p5)
}
 0x2f5   :  { %s835_s27 = scalar_lea.hbm %s1023_s8, 16 }
 0x2f6   :  { %p836_p6 = scmp.ne.s32.totalorder %s1023_s8, %s835_s27  ;;  %p839_p7 = scmp.lt.u32.totalorder %s835_s27, %s1023_s8 }
 0x2f8   :  { %p841_p8 = pnand %p839_p7, %p836_p6 }
 0x2fa   :  { %844 = shalt.err (!%p841_p8)
}
 0x2fb   :  { %575 = dma.vmem_to_hbm [thread:$0]  %s573_s21, 16, %s1023_s8, [#allocation5]  }
 0x2fc   :  { %851 = dma.done.wait [#allocation5], 16  }
 0x2fd   :  { %852 = vsyncadd [#allocation5], 4294967280 }
 0x2fe   :  { %579 = vsyncpa [#allocation4], 1 }
 0x2ff   :  { %580 = vsyncpa [#allocation9], 1 }
 0x300   :  { %581 = vsyncpa [#allocation5], 1 }
 0x301   :  { %582 = vsyncpa [#allocation6], 1 }

</bundles_post_ra>
